<compile_context>
chip_gen: v7x
topology: tpu7x:2x2x1
jax: 0.10.0
libtpu: 0.0.40
codegen_flags: <defaults>
</compile_context>

<pallas_src>
import functools
import jax
import jax.numpy as jnp
from jax import lax
from jax.experimental import pallas as pl
from jax.experimental.pallas import tpu as pltpu


# ----------------------------------------------------------------------------
# Pallas kernels: fused (bf16 matmul -> f32 acc) + bias + activation (+ residual)
# ----------------------------------------------------------------------------
def _round_up(x, m):
    return (x + m - 1) // m * m


def _mm_bias_act_kernel(x_ref, w_ref, b_ref, o_ref, acc_ref, *, act):
    @pl.when(pl.program_id(2) == 0)
    def _():
        acc_ref[...] = jnp.zeros_like(acc_ref)

    acc_ref[...] += jnp.dot(x_ref[...], w_ref[...],
                            preferred_element_type=jnp.float32)

    @pl.when(pl.program_id(2) == pl.num_programs(2) - 1)
    def _():
        y = acc_ref[...] + b_ref[...]
        if act == "relu":
            y = jnp.maximum(y, 0.0)
        elif act == "leaky":                 # LeakyReluLayer: max(0.1*x, x)
            y = jnp.maximum(0.1 * y, y)
        o_ref[...] = y.astype(o_ref.dtype)


def _mm_bias_res_relu_kernel(x_ref, w_ref, b_ref, r_ref, o_ref, acc_ref):
    """Bottleneck conv3 tail: relu((x @ w) + bias + residual), fully fused."""
    @pl.when(pl.program_id(2) == 0)
    def _():
        acc_ref[...] = jnp.zeros_like(acc_ref)

    acc_ref[...] += jnp.dot(x_ref[...], w_ref[...],
                            preferred_element_type=jnp.float32)

    @pl.when(pl.program_id(2) == pl.num_programs(2) - 1)
    def _():
        y = acc_ref[...] + b_ref[...] + r_ref[...].astype(jnp.float32)
        o_ref[...] = jnp.maximum(y, 0.0).astype(o_ref.dtype)


def matmul_bias_act(x, w, bias, act="none", residual=None,
                    out_dtype=jnp.bfloat16):
    """out = act((x @ w) + bias [+ residual]); bias is per output column.

    x: (M, K) any float dtype (cast to bf16), w: (K, N) bf16 (BN scale pre-folded),
    bias: (N,) f32, residual: optional (M, N).  Accumulation is f32 on the MXU.
    """
    M, K = x.shape
    _, N = w.shape
    # Tile selection: big tiles to fill the 256-wide MXU and amortize grid overhead;
    # worst case (512x1024 bf16 A, 1024x256 bf16 B, f32 acc) is ~3.5 MB double
    # buffered -> comfortably inside default scoped VMEM on v5e/v6e/v7x.
    tm = min(512, _round_up(M, 128))
    tn = min(256, _round_up(N, 128))
    k128 = _round_up(K, 128)
    tk = k128 if k128 <= 1024 else 512
    Mp, Np, Kp = _round_up(M, tm), _round_up(N, tn), _round_up(K, tk)

    xp = jnp.pad(x.astype(jnp.bfloat16), ((0, Mp - M), (0, Kp - K)))
    wp = jnp.pad(w.astype(jnp.bfloat16), ((0, Kp - K), (0, Np - N)))
    bp = jnp.pad(bias.astype(jnp.float32)[None, :], ((0, 0), (0, Np - N)))

    in_specs = [
        pl.BlockSpec((tm, tk), lambda i, j, k: (i, k)),
        pl.BlockSpec((tk, tn), lambda i, j, k: (k, j)),
        pl.BlockSpec((1, tn), lambda i, j, k: (0, j)),
    ]
    operands = [xp, wp, bp]
    bytes_accessed = (Mp * Kp + Kp * Np) * 2 + Np * 4 \
        + Mp * Np * jnp.dtype(out_dtype).itemsize

    if residual is not None:
        rp = jnp.pad(residual.astype(jnp.bfloat16), ((0, Mp - M), (0, Np - N)))
        in_specs.append(pl.BlockSpec((tm, tn), lambda i, j, k: (i, j)))
        operands.append(rp)
        kernel = _mm_bias_res_relu_kernel
        bytes_accessed += Mp * Np * 2
    else:
        kernel = functools.partial(_mm_bias_act_kernel, act=act)

    grid = (Mp // tm, Np // tn, Kp // tk)
    out = pl.pallas_call(
        kernel,
        out_shape=jax.ShapeDtypeStruct((Mp, Np), out_dtype),
        grid_spec=pltpu.PrefetchScalarGridSpec(
            num_scalar_prefetch=0,
            grid=grid,
            in_specs=in_specs,
            out_specs=pl.BlockSpec((tm, tn), lambda i, j, k: (i, j)),
            scratch_shapes=[pltpu.VMEM((tm, tn), jnp.float32)],
        ),
        compiler_params=pltpu.CompilerParams(
            dimension_semantics=("parallel", "parallel", "arbitrary")),
        cost_estimate=pl.CostEstimate(
            flops=2 * Mp * Np * Kp, transcendentals=0,
            bytes_accessed=int(bytes_accessed)),
    )(*operands)
    return out[:M, :N]


# ----------------------------------------------------------------------------
# Conv / pooling / interpolation wrappers (glue around the Pallas matmul)
# ----------------------------------------------------------------------------
def conv2d(x, cp, stride=1, padding=0, dilation=1, act="none",
           residual=None, out_dtype=jnp.bfloat16):
    """NHWC conv; cp holds pre-folded (K, N) bf16 weight matrix + f32 bias."""
    N, H, W, Cin = x.shape
    kh, kw = cp["kh"], cp["kw"]
    wmat, bias = cp["w"], cp["b"]
    Cout = wmat.shape[1]
    Ho = (H + 2 * padding - dilation * (kh - 1) - 1) // stride + 1
    Wo = (W + 2 * padding - dilation * (kw - 1) - 1) // stride + 1
    if kh == 1 and kw == 1 and padding == 0 and dilation == 1:
        xs = x[:, ::stride, ::stride, :]
        patches = xs.reshape(N * Ho * Wo, Cin)
    else:
        # TODO(synk): lower the kh*kw taps into the Pallas K grid axis (direct conv
        # with Element offsets into the padded NHWC tensor) to remove the 9x bf16
        # patch materialization for 3x3 convs.
        xp = jnp.pad(x, ((0, 0), (padding, padding), (padding, padding), (0, 0)))
        cols = []
        for i in range(kh):
            for j in range(kw):
                hs, ws = i * dilation, j * dilation
                sl = xp[:, hs:hs + (Ho - 1) * stride + 1:stride,
                        ws:ws + (Wo - 1) * stride + 1:stride, :]
                cols.append(sl)
        patches = jnp.concatenate(cols, axis=-1).reshape(N * Ho * Wo, kh * kw * Cin)
    patches = patches.astype(jnp.bfloat16)
    res2d = None
    if residual is not None:
        res2d = residual.reshape(N * Ho * Wo, Cout).astype(jnp.bfloat16)
    out = matmul_bias_act(patches, wmat, bias, act=act, residual=res2d,
                          out_dtype=out_dtype)
    return out.reshape(N, Ho, Wo, Cout)


def max_pool_3x3_s2_p1(x):
    neg_inf = jnp.array(-jnp.inf, dtype=x.dtype)
    return lax.reduce_window(x, neg_inf, lax.max,
                             (1, 3, 3, 1), (1, 2, 2, 1),
                             ((0, 0), (1, 1), (1, 1), (0, 0)))


def avg_pool(x, kernel, stride):
    xf = x.astype(jnp.float32)
    s = lax.reduce_window(xf, jnp.array(0.0, jnp.float32), lax.add,
                          (1, kernel, kernel, 1), (1, stride, stride, 1), "VALID")
    return (s / float(kernel * kernel)).astype(x.dtype)


def interp_bilinear_align(x, out_h, out_w):
    """F.interpolate(mode='bilinear', align_corners=True), NHWC; keeps input dtype."""
    N, H, W, C = x.shape
    if H == out_h and W == out_w:
        return x
    xf = x.astype(jnp.float32)

    def coords(o, i):
        if o == 1:
            return jnp.zeros((1,), jnp.float32)
        return jnp.arange(o, dtype=jnp.float32) * ((i - 1) / (o - 1))

    ys, xs = coords(out_h, H), coords(out_w, W)
    y0 = jnp.clip(jnp.floor(ys).astype(jnp.int32), 0, H - 1)
    y1 = jnp.clip(y0 + 1, 0, H - 1)
    wy = (ys - y0.astype(jnp.float32))[None, :, None, None]
    x0 = jnp.clip(jnp.floor(xs).astype(jnp.int32), 0, W - 1)
    x1 = jnp.clip(x0 + 1, 0, W - 1)
    wx = (xs - x0.astype(jnp.float32))[None, None, :, None]
    rows = xf[:, y0, :, :] * (1.0 - wy) + xf[:, y1, :, :] * wy
    out = rows[:, :, x0, :] * (1.0 - wx) + rows[:, :, x1, :] * wx
    return out.astype(x.dtype)


# ----------------------------------------------------------------------------
# Deterministic parameter initialization (BN folded, weights pre-transposed bf16)
# ----------------------------------------------------------------------------
class _KeyGen:
    def __init__(self, seed):
        self.key = jax.random.PRNGKey(seed)

    def __call__(self):
        self.key, k = jax.random.split(self.key)
        return k


KG = _KeyGen(42)


def init_conv_w(cout, cin, kh, kw):
    fan_in = cin * kh * kw
    return jax.random.normal(KG(), (cout, cin, kh, kw), jnp.float32) * jnp.sqrt(2.0 / fan_in)


def init_bias(c):
    return 0.01 * jax.random.normal(KG(), (c,), jnp.float32)


def init_bn_params(c, eps=1e-5):
    # eval-mode BatchNorm (running stats) -> per-channel (scale, bias)
    gamma = 1.0 + 0.1 * jax.random.normal(KG(), (c,), jnp.float32)
    beta = 0.1 * jax.random.normal(KG(), (c,), jnp.float32)
    mean = 0.1 * jax.random.normal(KG(), (c,), jnp.float32)
    var = 1.0 + 0.1 * jax.random.uniform(KG(), (c,), jnp.float32)
    scale = gamma / jnp.sqrt(var + eps)
    return scale, beta - mean * scale


def _fold(w_oihw, scale, bias):
    """Store weight as (kh*kw*Cin, Cout) bf16 with BN/identity scale folded in."""
    cout, cin, kh, kw = w_oihw.shape
    wmat = jnp.transpose(w_oihw, (2, 3, 1, 0)).reshape(kh * kw * cin, cout)
    wmat = wmat * scale[None, :]
    return {"w": wmat.astype(jnp.bfloat16), "b": bias.astype(jnp.float32),
            "kh": kh, "kw": kw}


def init_conv_bn(cout, cin, kh, kw):
    return _fold(init_conv_w(cout, cin, kh, kw), *init_bn_params(cout))


def init_conv_bias(cout, cin, kh, kw):
    return _fold(init_conv_w(cout, cin, kh, kw),
                 jnp.ones((cout,), jnp.float32), init_bias(cout))


# ----------------------------------------------------------------------------
# Bottleneck block (standard CE2P Bottleneck, expansion=4)
# ----------------------------------------------------------------------------
def init_bottleneck(inplanes, planes, stride=1, dilation=1, downsample=False, multi_grid=1):
    d = dilation * multi_grid
    p = {
        "conv1": init_conv_bn(planes, inplanes, 1, 1),
        "conv2": init_conv_bn(planes, planes, 3, 3),
        "conv3": init_conv_bn(planes * 4, planes, 1, 1),
        "stride": stride, "dil": d,
    }
    if downsample:
        p["ds"] = init_conv_bn(planes * 4, inplanes, 1, 1)
    return p


def bottleneck_fwd(p, x):
    out = conv2d(x, p["conv1"], act="relu")
    out = conv2d(out, p["conv2"], stride=p["stride"],
                 padding=p["dil"], dilation=p["dil"], act="relu")
    if "ds" in p:
        residual = conv2d(x, p["ds"], stride=p["stride"], act="none")
    else:
        residual = x
    # conv3 + BN3 + residual add + ReLU fused in one Pallas kernel epilogue.
    return conv2d(out, p["conv3"], act="none", residual=residual)


def init_layer(state, planes, blocks, stride=1, dilation=1, multi_grid=1):
    inplanes = state["inplanes"]
    need_ds = (stride != 1) or (inplanes != planes * 4)
    gen_mg = lambda idx, grids: grids[idx % len(grids)] if isinstance(grids, tuple) else 1
    layer = [init_bottleneck(inplanes, planes, stride, dilation, need_ds, gen_mg(0, multi_grid))]
    state["inplanes"] = planes * 4
    for i in range(1, blocks):
        layer.append(init_bottleneck(state["inplanes"], planes, 1, dilation, False,
                                     gen_mg(i, multi_grid)))
    return layer


def layer_fwd(layer, x):
    for blk in layer:
        x = bottleneck_fwd(blk, x)
    return x


# ----------------------------------------------------------------------------
# PSPModule / Edge_Module / Decoder_Module
# ----------------------------------------------------------------------------
PSP_SIZES = ((16, 16), (8, 8), (5, 6), (2, 6))


def init_psp(features=2048, out_features=512, sizes=PSP_SIZES):
    return {
        "sizes": sizes,
        "stages": [init_conv_bn(out_features, features, 1, 1) for _ in sizes],
        "bott": init_conv_bn(out_features, features + len(sizes) * out_features, 3, 3),
    }


def psp_fwd(p, feats):
    N, H, W, C = feats.shape
    priors = []
    for (stride, kernel), st in zip(p["sizes"], p["stages"]):
        y = avg_pool(feats, kernel, stride)          # AvgPool2d(stride=s, kernel=k)
        y = conv2d(y, st, act="leaky")               # 1x1 conv + InPlaceABNSync
        priors.append(interp_bilinear_align(y, H, W))
    priors.append(feats)
    cat = jnp.concatenate(priors, axis=-1)           # bf16 concat
    return conv2d(cat, p["bott"], padding=1, act="leaky")


def init_edge(in1=256, in2=512, in3=1024, mid=256, out=2):
    return {
        "c1": init_conv_bn(mid, in1, 1, 1),
        "c2": init_conv_bn(mid, in2, 1, 1),
        "c3": init_conv_bn(mid, in3, 1, 1),
        "c4": init_conv_bias(out, mid, 3, 3),
        "c5": init_conv_bias(out, out * 3, 1, 1),
    }


def edge_fwd(p, x1, x2, x3):
    h, w = x1.shape[1], x1.shape[2]
    e1f = conv2d(x1, p["c1"], act="leaky")
    e1 = conv2d(e1f, p["c4"], padding=1, act="none")
    e2f = conv2d(x2, p["c2"], act="leaky")
    e2 = conv2d(e2f, p["c4"], padding=1, act="none")
    e3f = conv2d(x3, p["c3"], act="leaky")
    e3 = conv2d(e3f, p["c4"], padding=1, act="none")
    e2f = interp_bilinear_align(e2f, h, w)
    e3f = interp_bilinear_align(e3f, h, w)
    e2 = interp_bilinear_align(e2, h, w)
    e3 = interp_bilinear_align(e3, h, w)
    edge = jnp.concatenate([e1, e2, e3], axis=-1)
    edge_fea = jnp.concatenate([e1f, e2f, e3f], axis=-1)
    edge = conv2d(edge, p["c5"], act="none")
    return edge, edge_fea


def init_decoder(num_classes, in1=512, in2=256):
    return {
        "c1": init_conv_bn(256, in1, 1, 1),
        "c2": init_conv_bn(48, in2, 1, 1),
        "c3a": init_conv_bn(256, 304, 1, 1),
        "c3b": init_conv_bn(256, 256, 1, 1),
        "c4": init_conv_bias(num_classes, 256, 1, 1),
    }


def decoder_fwd(p, xt, xl):
    h, w = xl.shape[1], xl.shape[2]
    xt = conv2d(xt, p["c1"], act="leaky")
    xt = interp_bilinear_align(xt, h, w)
    xl = conv2d(xl, p["c2"], act="leaky")
    x = jnp.concatenate([xt, xl], axis=-1)
    x = conv2d(x, p["c3a"], act="leaky")
    x = conv2d(x, p["c3b"], act="leaky")
    seg = conv2d(x, p["c4"], act="none")
    return seg, x


# ----------------------------------------------------------------------------
# ResNet (AugmentCE2P) — parameters and forward
# ----------------------------------------------------------------------------
def init_resnet(layers, num_classes):
    state = {"inplanes": 128}
    P = {
        "conv1": init_conv_bn(64, 3, 3, 3),
        "conv2": init_conv_bn(64, 64, 3, 3),
        "conv3": init_conv_bn(128, 64, 3, 3),
    }
    P["layer1"] = init_layer(state, 64, layers[0])
    P["layer2"] = init_layer(state, 128, layers[1], stride=2)
    P["layer3"] = init_layer(state, 256, layers[2], stride=2)
    P["layer4"] = init_layer(state, 512, layers[3], stride=1, dilation=2, multi_grid=(1, 1, 1))
    P["psp"] = init_psp(2048, 512)
    P["edge"] = init_edge()
    P["decoder"] = init_decoder(num_classes)
    P["fus1"] = init_conv_bn(256, 1024, 1, 1)
    P["fus2"] = init_conv_bias(num_classes, 256, 1, 1)
    return P


def resnet_fwd(P, x_nchw):
    x = jnp.transpose(x_nchw, (0, 2, 3, 1)).astype(jnp.bfloat16)  # NCHW -> NHWC bf16
    x = conv2d(x, P["conv1"], stride=2, padding=1, act="relu")
    x = conv2d(x, P["conv2"], padding=1, act="relu")
    x = conv2d(x, P["conv3"], padding=1, act="relu")
    x = max_pool_3x3_s2_p1(x)
    x2 = layer_fwd(P["layer1"], x)
    x3 = layer_fwd(P["layer2"], x2)
    x4 = layer_fwd(P["layer3"], x3)
    x5 = layer_fwd(P["layer4"], x4)
    xc = psp_fwd(P["psp"], x5)
    parsing_result, parsing_fea = decoder_fwd(P["decoder"], xc, x2)
    edge_result, edge_fea = edge_fwd(P["edge"], x2, x3, x4)
    x = jnp.concatenate([parsing_fea, edge_fea], axis=-1)
    x = conv2d(x, P["fus1"], act="leaky")
    # Dropout2d(0.1): identity (deterministic eval-mode semantics)
    fusion = conv2d(x, P["fus2"], act="none", out_dtype=jnp.float32)
    return jnp.transpose(fusion, (0, 3, 1, 2))  # NHWC -> NCHW


if __name__ == "__main__":
    num_classes = 7
    layers = [1, 1, 1, 1]  # smallest Bottleneck-ResNet configuration consistent with the module
    params = init_resnet(layers, num_classes)
    # PSPModule's (16,16) avg-pool stage requires x5 spatial >= 16 -> input 256x256 minimum.
    x = jax.random.normal(jax.random.PRNGKey(0), (1, 3, 256, 256), jnp.float32)
    out = resnet_fwd(params, x)
    out = jax.block_until_ready(out)
    assert out.shape == (1, num_classes, 64, 64), out.shape
    assert bool(jnp.all(jnp.isfinite(out)))
    print("KERNEL_OK")
</pallas_src>

<mosaic_0001>
module attributes {stable_mosaic.version = 11 : i64} {
  func.func @_mm_bias_act_kernel(%arg0: i32, %arg1: i32, %arg2: i32, %arg3: memref<512x128xbf16, #tpu.memory_space<vmem>>, %arg4: memref<128x128xbf16, #tpu.memory_space<vmem>>, %arg5: memref<1x128xf32, #tpu.memory_space<vmem>>, %arg6: memref<512x128xbf16, #tpu.memory_space<vmem>>, %arg7: memref<512x128xf32, #tpu.memory_space<vmem>>) attributes {dimension_semantics = [#tpu.dimension_semantics<parallel>, #tpu.dimension_semantics<parallel>, #tpu.dimension_semantics<arbitrary>], iteration_bounds = array<i64: 32, 1, 1>, scalar_prefetch = 0 : i64, scratch_operands = 1 : i64, tpu.core_type = #tpu.core_type<tc>, window_params = [{transform_indices = @transform_0, window_bounds = array<i64: 512, 128>}, {transform_indices = @transform_1, window_bounds = array<i64: 128, 128>}, {transform_indices = @transform_2, window_bounds = array<i64: 1, 128>}, {transform_indices = @transform_3, window_bounds = array<i64: 512, 128>}]} {
    %c0_i32 = arith.constant 0 : i32
    %0 = arith.cmpi eq, %arg2, %c0_i32 : i32
    %1 = arith.extui %0 : i1 to i32
    %c0_i32_0 = arith.constant 0 : i32
    %2 = arith.cmpi ne, %1, %c0_i32_0 : i32
    scf.if %2 {
      %cst_10 = arith.constant 0.000000e+00 : f32
      %12 = vector.broadcast %cst_10 : f32 to vector<512x128xf32>
      %c0_11 = arith.constant 0 : index
      %c0_12 = arith.constant 0 : index
      %13 = vector.load %arg7[%c0_11, %c0_12] : memref<512x128xf32, #tpu.memory_space<vmem>>, vector<512x128xf32>
      tpu.vector_store %arg7[%c0_11, %c0_12], %12 {strides = array<i32>} : memref<512x128xf32, #tpu.memory_space<vmem>>, vector<512x128xf32>,
    } else {
    }
    %c0 = arith.constant 0 : index
    %c0_1 = arith.constant 0 : index
    %3 = vector.load %arg7[%c0, %c0_1] : memref<512x128xf32, #tpu.memory_space<vmem>>, vector<512x128xf32>
    %c0_2 = arith.constant 0 : index
    %c0_3 = arith.constant 0 : index
    %4 = vector.load %arg3[%c0_2, %c0_3] : memref<512x128xbf16, #tpu.memory_space<vmem>>, vector<512x128xbf16>
    %c0_4 = arith.constant 0 : index
    %c0_5 = arith.constant 0 : index
    %5 = vector.load %arg4[%c0_4, %c0_5] : memref<128x128xbf16, #tpu.memory_space<vmem>>, vector<128x128xbf16>
    %cst = arith.constant dense<0.000000e+00> : vector<512x128xf32>
    %6 = tpu.matmul %4, %5, %cst {dimension_numbers = #tpu.dot_dimension_numbers<[1], [0], [0], [1], [0, 0, 1, 1], [], []>} : vector<512x128xbf16>, vector<128x128xbf16>, vector<512x128xf32> -> vector<512x128xf32>
    %7 = arith.addf %3, %6 : vector<512x128xf32>
    %c0_6 = arith.constant 0 : index
    %c0_7 = arith.constant 0 : index
    %8 = vector.load %arg7[%c0_6, %c0_7] : memref<512x128xf32, #tpu.memory_space<vmem>>, vector<512x128xf32>
    tpu.vector_store %arg7[%c0_6, %c0_7], %7 {strides = array<i32>} : memref<512x128xf32, #tpu.memory_space<vmem>>, vector<512x128xf32>,
    %c0_i32_8 = arith.constant 0 : i32
    %9 = arith.cmpi eq, %arg2, %c0_i32_8 : i32
    %10 = arith.extui %9 : i1 to i32
    %c0_i32_9 = arith.constant 0 : i32
    %11 = arith.cmpi ne, %10, %c0_i32_9 : i32
    scf.if %11 {
      %c0_10 = arith.constant 0 : index
      %c0_11 = arith.constant 0 : index
      %12 = vector.load %arg7[%c0_10, %c0_11] : memref<512x128xf32, #tpu.memory_space<vmem>>, vector<512x128xf32>
      %c0_12 = arith.constant 0 : index
      %c0_13 = arith.constant 0 : index
      %13 = vector.load %arg5[%c0_12, %c0_13] : memref<1x128xf32, #tpu.memory_space<vmem>>, vector<1x128xf32>
      %14 = vector.broadcast %13 : vector<1x128xf32> to vector<512x128xf32>
      %15 = arith.addf %12, %14 : vector<512x128xf32>
      %cst_14 = arith.constant 0.000000e+00 : f32
      %16 = vector.broadcast %cst_14 : f32 to vector<512x128xf32>
      %17 = arith.maximumf %15, %16 : vector<512x128xf32>
      %18 = arith.truncf %17 : vector<512x128xf32> to vector<512x128xbf16>
      %c0_15 = arith.constant 0 : index
      %c0_16 = arith.constant 0 : index
      %19 = vector.load %arg6[%c0_15, %c0_16] : memref<512x128xbf16, #tpu.memory_space<vmem>>, vector<512x128xbf16>
      tpu.vector_store %arg6[%c0_15, %c0_16], %18 {strides = array<i32>} : memref<512x128xbf16, #tpu.memory_space<vmem>>, vector<512x128xbf16>,
    } else {
    }
    return
  }
  func.func @transform_0(%arg0: i32, %arg1: i32, %arg2: i32) -> (i32, i32) {
    %c0_i32 = arith.constant 0 : i32
    return %arg0, %arg2 : i32, i32
  }
  func.func @transform_1(%arg0: i32, %arg1: i32, %arg2: i32) -> (i32, i32) {
    %c0_i32 = arith.constant 0 : i32
    return %arg2, %arg1 : i32, i32
  }
  func.func @transform_2(%arg0: i32, %arg1: i32, %arg2: i32) -> (i32, i32) {
    %c0_i32 = arith.constant 0 : i32
    %c0_i32_0 = arith.constant 0 : i32
    return %c0_i32, %arg1 : i32, i32
  }
  func.func @transform_3(%arg0: i32, %arg1: i32, %arg2: i32) -> (i32, i32) {
    %c0_i32 = arith.constant 0 : i32
    return %arg0, %arg1 : i32, i32
  }
}

</mosaic_0001>

<bundles_post_ra>
// kernel: tpu_custom_call.1
= control target key start
LH: loop header
LB: loop body
LE: loop exit
PB: predicated region body
PF: predicated region fallthrough
CT: control target
= control target key end

     0   :  { %8 = vsyncpa [#allocation4], 0  ;;  %s3019_s0 = inlined_call_operand.hbm [shape: bf16[16384,128], index: 0, kind: input, shape index: {}]   ;;  %s3020_s1 = inlined_call_operand.hbm [shape: bf16[128,128], index: 1, kind: input, shape index: {}]   ;;  %s3021_s2 = inlined_call_operand.hbm [shape: f32[1,128], index: 2, kind: input, shape index: {}]   ;;  %s3022_s3 = inlined_call_operand.hbm [shape: bf16[16384,128], index: 3, kind: output, shape index: {}]  }
   0x1   :  { %10 = vsyncpa [#allocation4 + $0x1], 0 }
   0x2   :  { %11 = vsyncpa [#allocation7], 0 }
   0x3   :  { %12 = vsyncpa [#allocation5], 0 }
   0x4   :  { %14 = vsyncpa [#allocation5 + $0x1], 0  ;;  %s2627_s12 = smov 0   ;;  %s2629_s13 = smov 0  }
   0x5   :  { %s2631_s14 = smov 0   ;;  %s2633_s15 = smov 0  }
   0x6   :  { %s2635_s16 = smov 0   ;;  %s2637_s17 = smov 0  }
   0x7 LB: > { %s1781_s18 = sadd.s32 4294967295, %s2597_s17   ;;  %s1782_s19 = sadd.s32 4294967294, %s2597_s17   ;;  %s2597_s17 = sphi %s2637_s17, %s20_s17   ;;  %s2593_s16 = sphi %s2635_s16, %s3044_s16   ;;  %s2589_s15 = sphi %s2633_s15, %s3043_s15   ;;  %s2585_s14 = sphi %s2631_s14, %s3042_s14   ;;  %s2581_s13 = sphi %s2629_s13, %s3041_s13   ;;  %s2577_s12 = sphi %s2627_s12, %s3040_s12  }
   0x8   : > { %p61_p0 = scmp.ne.s32.totalorder %s2581_s13, %s2577_s12  ;;  %p2661_p1 = scmp.eq.s32.totalorder %s1781_s18, 0 }
   0x9   : > { %p2665_p2 = scmp.eq.s32.totalorder %s1781_s18, 31  ;;  %p147_p3 = scmp.eq.s32.totalorder %s1782_s19, 31 }
   0xa   : > { %s3027_s20 = scalar_select %p2661_p1, 1, 0 }
   0xb   : > { %s3028_s21 = scalar_select %p2665_p2, 1, 0 }
   0xc   : > { %p2671_p4 = por %p2661_p1, %p61_p0  ;;  %p1783_p5 = scmp.ge.s32.totalorder %s2597_s17, 1 }
   0xd   : > { %p2676_p6 = por %p147_p3, %p61_p0  ;;  %p154_p7 = scmp.lt.s32.totalorder %s2597_s17, 33 }
   0xe   : > { %s3029_s22 = scalar_select %p2671_p4, 1, 0 }
   0xf   : > { %s3030_s23 = scalar_select %p2676_p6, 1, 0 }
  0x10   : > { %p2681_p8 = pnand %p1783_p5, %p154_p7  ;;  %s2599_s25 = smov [#allocation6]  }
  0x11   : > { %s170_s26 = sshll.u32 %s2599_s25, 4  ;;  %s2600_s28 = smov [#allocation8]   ;;  %s171_s26 = int_to_ptr.vmem [resolvable:$true] %s170_s26 }
  0x12   : > { %s3031_s24 = scalar_select %p2681_p8, 1, 0 }
  0x13   : > { %p2310_p9 = pneg %p2681_p8  ;;  %s186_s29 = sshll.u32 %s2600_s28, 4  ;;  %s2693_s29 = int_to_ptr.vmem [resolvable:$true] %s186_s29 }
  0x14   : > { %s2425_s5 = scalar_lea.hbm %s3020_s1, 1024 }
  0x15   : > { %p2689_p10 = pnand %p2310_p9, %p2661_p1  ;;  %p2426_p11 = scmp.ne.s32.totalorder %s3020_s1, %s2425_s5 }
  0x16   : > { %p2432_p3 = scmp.lt.u32.totalorder %s2425_s5, %s3020_s1 }
  0x17   : > { %p2427_p12 = pneg %p2689_p10 }
  0x19   : > { %p2428_p13 = pnand %p2427_p12, %p2426_p11 }
  0x1b   : > { %p2429_p0 = pneg %p2428_p13 }
  0x1d   : > { %p2434_p5 = pnand %p2432_p3, %p2429_p0 }
  0x1f   : > { %2437 = shalt.err (!%p2434_p5)
}
  0x20   : > { %s2438_s10 = scalar_lea.vmem %s171_s26, 1024  ;;  %p2446_p1 = scmp.lt.s32.totalorder %s171_s26, %s171_s26 }
  0x21   : > { %p2439_p7 = scmp.ne.s32.totalorder %s171_s26, %s2438_s10  ;;  %p2447_p4 = scmp.lt.s32.totalorder %s2438_s10, %s2438_s10 }
  0x23   : > { %p2441_p9 = pnand %p2439_p7, %p2427_p12  ;;  %p2448_p8 = por %p2447_p4, %p2446_p1 }
  0x25   : > { %p2442_p6 = pneg %p2441_p9 }
  0x27   : > { %p2449_p2 = pnand %p2448_p8, %p2442_p6 }
  0x29   : > { %2452 = shalt.err (!%p2449_p2)
}
  0x2a   : > { %s2601_s11 = smov 64   ;;  %s2602_s18 = smov 4  }
  0x2b   : > { %2313 = dma.hbm_to_vmem [thread:$0]  (!%p2689_p10), %s3020_s1, 1024, %s171_s26, [#allocation7], %s2601_s11, %s2601_s11, %s2602_s18  }
  0x2c   : > { %s2453_s4 = scalar_lea.hbm %s3021_s2, 16 }
  0x2d   : > { %p2454_p1 = scmp.ne.s32.totalorder %s3021_s2, %s2453_s4  ;;  %p2460_p6 = scmp.lt.u32.totalorder %s2453_s4, %s3021_s2 }
  0x2f   : > { %p2456_p2 = pnand %p2454_p1, %p2427_p12 }
  0x31   : > { %p2457_p4 = pneg %p2456_p2 }
  0x33   : > { %p2462_p8 = pnand %p2460_p6, %p2457_p4 }
  0x35   : > { %2465 = shalt.err (!%p2462_p8)
}
  0x36   : > { %s2466_s26 = scalar_lea.vmem %s2693_s29, 16  ;;  %s2473_s9 = scalar_lea.vmem %s2693_s29, 32 }
  0x37   : > { %p2467_p11 = scmp.ne.s32.totalorder %s2693_s29, %s2466_s26  ;;  %p2474_p3 = scmp.lt.s32.totalorder %s2693_s29, %s2693_s29 }
  0x38   : > { %p2475_p5 = scmp.lt.s32.totalorder %s2473_s9, %s2466_s26 }
  0x39   : > { %p2469_p13 = pnand %p2467_p11, %p2427_p12 }
  0x3a   : > { %p2476_p7 = por %p2475_p5, %p2474_p3 }
  0x3b   : > { %p2470_p0 = pneg %p2469_p13 }
  0x3d   : > { %p2477_p9 = pnand %p2476_p7, %p2470_p0 }
  0x3f   : > { %2480 = shalt.err (!%p2477_p9)
}
  0x40   : > { %2316 = dma.hbm_to_vmem [thread:$0]  (!%p2689_p10), %s3021_s2, 16, %s2693_s29, [#allocation7]  }
  0x41   : > { %s39_s25 = sadd.s32 1, %s2593_s16  ;;  %s48_s28 = sadd.s32 1, %s2585_s14 }
  0x42   : > { %p41_p12 = scmp.ge.s32.totalorder %s39_s25, 32  ;;  %p55_p1 = scmp.ne.s32.totalorder %s2585_s14, %s2581_s13 }
  0x43   : > { %p56_p2 = scmp.eq.s32.totalorder %s2597_s17, 0  ;;  %p2327_p4 = scmp.lt.s32.totalorder %s2597_s17, 32 }
  0x44   : > { %s3046_s25 = smov (%p41_p12, %s39_s25), 0  ;;  %p3033_p8 = scmp.ne.s32.totalorder %s3028_s21, 0 }
  0x45   : > { %p57_p6 = por %p56_p2, %p55_p1  ;;  %s43_s30 = ssub.s32 %s2593_s16, %s3046_s25 }
  0x46   : > { %p2756_p11 = por %p3033_p8, %p55_p1  ;;  %s197_s4 = sand.u32 1, %s2585_s14  }
  0x47   : > { %p46_p13 = scmp.eq.s32.totalorder %s43_s30, 0  ;;  %s1787_s29 = sshll.u32 %s197_s4, 8 }
  0x48   : > { %s1905_s5 = sshll.u32 %s2593_s16, 12  ;;  %s201_s21 = scalar_lea.vmem [#allocation3], %s1787_s29 }
  0x49   : > { %s2765_s6 = scalar_select %p46_p13, %s2585_s14, %s48_s28  }
  0x4a   : > { %s2770_s26 = scalar_lea.hbm %s3019_s0, %s1905_s5  ;;  %s209_s9 = sshll.u32 %s201_s21, 4  ;;  %s2778_s9 = int_to_ptr.vmem [resolvable:$true] %s209_s9 }
  0x4b   : > { %p2774_p10 = pnand %p2327_p4, %p57_p6  ;;  %s2780_s19 = scalar_lea.sflag [#allocation4], %s197_s4 }
  0x4c   : > { %s2481_s28 = scalar_lea.hbm %s2770_s26, 4096  ;;  %s2486_s5 = scalar_lea.hbm %s3019_s0, 131072 }
  0x4d   : > { %p2482_p0 = scmp.ne.s32.totalorder %s2770_s26, %s2481_s28  ;;  %p2483_p3 = pneg %p2774_p10 }
  0x4e   : > { %p2487_p9 = scmp.lt.u32.totalorder %s2770_s26, %s3019_s0  ;;  %p2488_p12 = scmp.lt.u32.totalorder %s2486_s5, %s2481_s28 }
  0x4f   : > { %p2484_p5 = pnand %p2483_p3, %p2482_p0  ;;  %p2490_p2 = scmp.lt.u32.totalorder %s2481_s28, %s2770_s26 }
  0x50   : > { %p2489_p1 = por %p2488_p12, %p2487_p9 }
  0x51   : > { %p2485_p7 = pneg %p2484_p5 }
  0x52   : > { %p2491_p4 = por %p2490_p2, %p2489_p1 }
  0x54   : > { %p2492_p6 = pnand %p2491_p4, %p2485_p7 }
  0x56   : > { %2495 = shalt.err (!%p2492_p6)
}
  0x57   : > { %s2496_s4 = scalar_lea.vmem %s2778_s9, 4096  ;;  %s2603_s21 = smov [#allocation3]  }
  0x58   : > { %p2497_p8 = scmp.ne.s32.totalorder %s2778_s9, %s2496_s4  ;;  %s2501_s30 = sshll.u32 %s2603_s21, 4  ;;  %s2502_s30 = int_to_ptr.vmem [resolvable:$false] %s2501_s30 }
  0x59   : > { %s2503_s29 = scalar_lea.vmem %s2502_s30, 8192  ;;  %p2504_p5 = scmp.lt.s32.totalorder %s2778_s9, %s2502_s30 }
  0x5a   : > { %p2499_p13 = pnand %p2497_p8, %p2483_p3  ;;  %p2505_p9 = scmp.lt.s32.totalorder %s2503_s29, %s2496_s4 }
  0x5c   : > { %p2500_p0 = pneg %p2499_p13  ;;  %p2506_p12 = por %p2505_p9, %p2504_p5 }
  0x5e   : > { %p2507_p1 = pnand %p2506_p12, %p2500_p0 }
  0x60   : > { %2510 = shalt.err (!%p2507_p1)
}
  0x61   : > { %2320 = dma.hbm_to_vmem [thread:$0]  (!%p2774_p10), %s2770_s26, 4096, %s2778_s9, %s2780_s19, %s2601_s11, %s2601_s11, %s2602_s18  }
  0x62   : > { %p3036_p3 = scmp.ne.s32.totalorder %s3031_s24, 0 }
  0x63   : > { %s2814_s28 = sand.u32 (!%p3036_p3), 1, %s2581_s13   ;;  %p3037_p7 = scmp.ne.s32.totalorder (!%p3036_p3), %s3029_s22, 0 }
  0x64   : > { %221 = sbr.rel (%p3036_p3) target bundleno = 436 (0x1b4), region = 32  ;;  %s1791_s5 = sshll.u32 (!%p3036_p3), %s2814_s28, 8 }
  0x65   : > { %s224_s7 = scalar_lea.sflag (!%p3036_p3), [#allocation4], %s2814_s28  ;;  %s2820_s10 = scalar_lea.vmem (!%p3036_p3), [#allocation3], %s1791_s5 }
  0x6b   : > { %2564 = dma.done.wait (%p3037_p7), %s224_s7, 4096  }
  0x6c   : > { %2566 = vsyncadd (%p3037_p7), %s224_s7, 4294963200  ;;  %p3038_p10 = scmp.ne.s32.totalorder %s3027_s20, 0 }
  0x6e   : > { %2568 = dma.done.wait (%p3038_p10), [#allocation7], 1040  }
  0x6f   : > { %2570 = vsyncadd (%p3038_p10), [#allocation7], 4294966256  ;;  %v2385_v0 = vld [vmem:[#allocation6] sm:$0xff]   ;;  %v2386_v1 = vld [vmem:[#allocation6 + $0x8] sm:$0xff]   ;;  %s2874_s20 = scalar_lea.vmem [#allocation9], %s1791_s5  ;;  %s1970_s22 = sshll.u32 %s2589_s15, 12 }
  0x70   : > { %2202 = vmatprep.subr.bf16.mxu0 %v2385_v0  ;;  %2282 = vmatprep.subr.bf16.mxu1 %v2385_v0  ;;  %v2387_v2 = vld [vmem:[#allocation6 + $0x10] sm:$0xff]   ;;  %v2388_v3 = vld [vmem:[#allocation6 + $0x18] sm:$0xff]   ;;  %v2393_v4 = vld [vmem:[%s2820_s10] sm:$0xff]   ;;  %s1668_s24 = sshll.u32 %s2874_s20, 4  ;;  %s2965_s15 = scalar_lea.hbm %s3022_s3, %s1970_s22  ;;  %s2967_s24 = int_to_ptr.vmem [resolvable:$true] %s1668_s24 }
  0x71   : > { %2203 = vmatpush3.bf16.msra.mxu0 %v2385_v0  ;;  %2290 = vmatpush3.bf16.msra.mxu1 %v2385_v0  ;;  %v2394_v5 = vld [vmem:[%s2820_s10 + $0x80] sm:$0xff]   ;;  %v2390_v7 = vld [vmem:[#allocation6 + $0x28] sm:$0xff]   ;;  %v2391_v8 = vld [vmem:[#allocation6 + $0x30] sm:$0xff]   ;;  %s1654_s26 = scalar_lea.sflag [#allocation5], %s2814_s28  ;;  %s2511_s9 = scalar_lea.vmem %s2967_s24, 4096 }
  0x72   : > { %2204 = vmatprep.subr.bf16.mxu0 %v2386_v1  ;;  %2283 = vmatprep.subr.bf16.mxu1 %v2386_v1  ;;  %v2389_v6 = vld [vmem:[#allocation6 + $0x20] sm:$0xff]   ;;  %v2392_v9 = vld [vmem:[#allocation6 + $0x38] sm:$0xff]   ;;  %v2395_v10 = vld [vmem:[%s2820_s10 + $0x8] sm:$0xff]   ;;  %p2512_p2 = scmp.ne.s32.totalorder %s2967_s24, %s2511_s9  ;;  %s2604_s19 = smov [#allocation9]  }
  0x73   : > { %2218 = vmatprep.mubr.bf16.mxu0 %v2393_v4  ;;  %2250 = vmatprep.mubr.bf16.mxu1 %v2394_v5  ;;  %v2396_v11 = vld [vmem:[%s2820_s10 + $0x88] sm:$0xff]   ;;  %v2397_v12 = vld [vmem:[%s2820_s10 + $0x10] sm:$0xff]   ;;  %v2399_v14 = vld [vmem:[%s2820_s10 + $0x18] sm:$0xff]   ;;  %s2515_s8 = sshll.u32 %s2604_s19, 4  ;;  %s2516_s8 = int_to_ptr.vmem [resolvable:$false] %s2515_s8 }
  0x74   : > { %v2398_v13 = vld [vmem:[%s2820_s10 + $0x90] sm:$0xff]   ;;  %v2400_v15 = vld [vmem:[%s2820_s10 + $0x98] sm:$0xff]   ;;  %v2401_v16 = vld [vmem:[%s2820_s10 + $0x20] sm:$0xff]   ;;  %p2513_p4 = pnand %p2512_p2, %p2756_p11  ;;  %s2517_s4 = scalar_lea.vmem %s2516_s8, 8192 }
  0x75   : > { %2205 = vmatpush3.bf16.msra.mxu0 %v2386_v1  ;;  %2291 = vmatpush3.bf16.msra.mxu1 %v2386_v1  ;;  %v2402_v17 = vld [vmem:[%s2820_s10 + $0xa0] sm:$0xff]   ;;  %v2403_v18 = vld [vmem:[%s2820_s10 + $0x28] sm:$0xff]   ;;  %v2405_v20 = vld [vmem:[%s2820_s10 + $0x30] sm:$0xff]   ;;  %p2518_p8 = scmp.lt.s32.totalorder %s2967_s24, %s2516_s8  ;;  %p2519_p13 = scmp.lt.s32.totalorder %s2517_s4, %s2511_s9 }
  0x76   : > { %2206 = vmatprep.subr.bf16.mxu0 %v2387_v2  ;;  %2284 = vmatprep.subr.bf16.mxu1 %v2387_v2  ;;  %v2404_v19 = vld [vmem:[%s2820_s10 + $0xa8] sm:$0xff]   ;;  %v2406_v21 = vld [vmem:[%s2820_s10 + $0xb0] sm:$0xff]   ;;  %v2407_v22 = vld [vmem:[%s2820_s10 + $0x38] sm:$0xff]   ;;  %p2514_p6 = pneg %p2513_p4 }
  0x77   : > { %v2408_v23 = vld [vmem:[%s2820_s10 + $0xb8] sm:$0xff]   ;;  %v2409_v24 = vld [vmem:[%s2820_s10 + $0x40] sm:$0xff]   ;;  %v2411_v26 = vld [vmem:[%s2820_s10 + $0x48] sm:$0xff]   ;;  %p2520_p0 = por %p2519_p13, %p2518_p8 }
  0x78   : > { %v2410_v25 = vld [vmem:[%s2820_s10 + $0xc0] sm:$0xff]   ;;  %v2412_v27 = vld [vmem:[%s2820_s10 + $0xc8] sm:$0xff]   ;;  %v2413_v28 = vld [vmem:[%s2820_s10 + $0x50] sm:$0xff]  }
  0x79   : > { %2207 = vmatpush3.bf16.msra.mxu0 %v2387_v2  ;;  %2292 = vmatpush3.bf16.msra.mxu1 %v2387_v2  ;;  %v2414_v29 = vld [vmem:[%s2820_s10 + $0xd0] sm:$0xff]   ;;  %v2415_v30 = vld [vmem:[%s2820_s10 + $0x58] sm:$0xff]   ;;  %v2417_v32 = vld [vmem:[%s2820_s10 + $0x60] sm:$0xff]   ;;  %p2521_p5 = pnand %p2520_p0, %p2514_p6 }
  0x7a   : > { %2208 = vmatprep.subr.bf16.mxu0 %v2388_v3  ;;  %2285 = vmatprep.subr.bf16.mxu1 %v2388_v3  ;;  %v2416_v31 = vld [vmem:[%s2820_s10 + $0xd8] sm:$0xff]   ;;  %v2418_v33 = vld [vmem:[%s2820_s10 + $0xe0] sm:$0xff]   ;;  %v2419_v34 = vld [vmem:[%s2820_s10 + $0x68] sm:$0xff]  }
  0x7b   : > { %v2420_v35 = vld [vmem:[%s2820_s10 + $0xe8] sm:$0xff]   ;;  %v2421_v36 = vld [vmem:[%s2820_s10 + $0x70] sm:$0xff]   ;;  %v2423_v38 = vld [vmem:[%s2820_s10 + $0x78] sm:$0xff]  }
  0x7c   : > { %v2422_v37 = vld [vmem:[%s2820_s10 + $0xf0] sm:$0xff]   ;;  %v2424_v39 = vld [vmem:[%s2820_s10 + $0xf8] sm:$0xff]   ;;  %v2862_v40 = vld [vmem:[#allocation8] ss:$0 sm:$0xff] }
  0x7d   : > { %2209 = vmatpush3.bf16.msra.mxu0 %v2388_v3  ;;  %2293 = vmatpush3.bf16.msra.mxu1 %v2388_v3 }
  0x7e   : > { %2210 = vmatprep.subr.bf16.mxu0 %v2389_v6  ;;  %2286 = vmatprep.subr.bf16.mxu1 %v2389_v6 }
  0x81   : > { %2211 = vmatpush3.bf16.msra.mxu0 %v2389_v6  ;;  %2294 = vmatpush3.bf16.msra.mxu1 %v2389_v6 }
  0x82   : > { %2212 = vmatprep.subr.bf16.mxu0 %v2390_v7  ;;  %2287 = vmatprep.subr.bf16.mxu1 %v2390_v7 }
  0x85   : > { %2213 = vmatpush3.bf16.msra.mxu0 %v2390_v7  ;;  %2295 = vmatpush3.bf16.msra.mxu1 %v2390_v7 }
  0x86   : > { %2214 = vmatprep.subr.bf16.mxu0 %v2391_v8  ;;  %2288 = vmatprep.subr.bf16.mxu1 %v2391_v8 }
  0x89   : > { %2215 = vmatpush3.bf16.msra.mxu0 %v2391_v8  ;;  %2296 = vmatpush3.bf16.msra.mxu1 %v2391_v8 }
  0x8a   : > { %2216 = vmatprep.subr.bf16.mxu0 %v2392_v9  ;;  %2289 = vmatprep.subr.bf16.mxu1 %v2392_v9 }
  0x8d   : > { %2217 = vmatpush3.bf16.msra.mxu0 %v2392_v9  ;;  %2297 = vmatpush3.bf16.msra.mxu1 %v2392_v9 }
  0x90   : > { %2219 = vmatmul.mubr.bf16.vlgmr.msra.gmra.mrb[0].mxu0 %v2395_v10  ;;  %2251 = vmatmul.mubr.bf16.vlgmr.msra.gmra.mrb[0].mxu1 %v2396_v11 }
  0x91   : > { %2222 = vmatprep.mubr.bf16.mxu0 %v2397_v12  ;;  %2254 = vmatprep.mubr.bf16.mxu1 %v2398_v13 }
  0x98   : > { %2223 = vmatmul.mubr.bf16.gmra.mrb[4].mxu0 %v2399_v14  ;;  %2255 = vmatmul.mubr.bf16.gmra.mrb[4].mxu1 %v2400_v15 }
  0x99   : > { %2226 = vmatprep.mubr.bf16.mxu0 %v2401_v16  ;;  %2258 = vmatprep.mubr.bf16.mxu1 %v2402_v17 }
  0xa0   : > { %2227 = vmatmul.mubr.bf16.gmra.mrb[8].mxu0 %v2403_v18  ;;  %2259 = vmatmul.mubr.bf16.gmra.mrb[8].mxu1 %v2404_v19 }
  0xa1   : > { %2230 = vmatprep.mubr.bf16.mxu0 %v2405_v20  ;;  %2262 = vmatprep.mubr.bf16.mxu1 %v2406_v21 }
  0xa8   : > { %2231 = vmatmul.mubr.bf16.gmra.mrb[12].mxu0 %v2407_v22  ;;  %2263 = vmatmul.mubr.bf16.gmra.mrb[12].mxu1 %v2408_v23 }
  0xa9   : > { %2234 = vmatprep.mubr.bf16.mxu0 %v2409_v24  ;;  %2266 = vmatprep.mubr.bf16.mxu1 %v2410_v25 }
  0xb0   : > { %2235 = vmatmul.mubr.bf16.gmra.mrb[16].mxu0 %v2411_v26  ;;  %2267 = vmatmul.mubr.bf16.gmra.mrb[16].mxu1 %v2412_v27 }
  0xb1   : > { %2238 = vmatprep.mubr.bf16.mxu0 %v2413_v28  ;;  %2270 = vmatprep.mubr.bf16.mxu1 %v2414_v29 }
  0xb8   : > { %2239 = vmatmul.mubr.bf16.gmra.mrb[20].mxu0 %v2415_v30  ;;  %2271 = vmatmul.mubr.bf16.gmra.mrb[20].mxu1 %v2416_v31 }
  0xb9   : > { %2242 = vmatprep.mubr.bf16.mxu0 %v2417_v32  ;;  %2274 = vmatprep.mubr.bf16.mxu1 %v2418_v33 }
  0xc0   : > { %2243 = vmatmul.mubr.bf16.gmra.mrb[24].mxu0 %v2419_v34  ;;  %2275 = vmatmul.mubr.bf16.gmra.mrb[24].mxu1 %v2420_v35 }
  0xc1   : > { %2246 = vmatprep.mubr.bf16.mxu0 %v2421_v36  ;;  %2278 = vmatprep.mubr.bf16.mxu1 %v2422_v37 }
  0xc8   : > { %2247 = vmatmul.mubr.bf16.gmra.mrb[28].mxu0 %v2423_v38  ;;  %2279 = vmatmul.mubr.bf16.gmra.mrb[28].mxu1 %v2424_v39 }
 0x163   : > { %v2220_v41 = vpop.f32.mrb[0].mxu0  ;;  %v2252_v42 = vpop.f32.mrb[0].mxu1 }
 0x164   : > { %v1207_v43 = vadd.f32 %v2220_v41, %v2862_v40  ;;  %v1239_v44 = vadd.f32 %v2252_v42, %v2862_v40  ;;  %v748_v45 = vpop.f32.mrb[1].mxu0  ;;  %v876_v46 = vpop.f32.mrb[1].mxu1 }
 0x165   : > { %v1205_v47 = vadd.f32 %v2862_v40, %v748_v45  ;;  %v1237_v48 = vadd.f32 %v2862_v40, %v876_v46  ;;  %v2221_v49 = vpop.f32.mrb[2].mxu0  ;;  %v2253_v50 = vpop.f32.mrb[2].mxu1 }
 0x166   : > { %v1208_v51 = vadd.f32 %v2221_v49, %v2862_v40  ;;  %v1240_v52 = vadd.f32 %v2253_v50, %v2862_v40  ;;  %v751_v53 = vpop.f32.mrb[3].mxu0  ;;  %v879_v54 = vpop.f32.mrb[3].mxu1  ;;  %v1271_v57 = vmax.f32 %v1207_v43, 0.0  ;;  %v1303_v58 = vmax.f32 %v1239_v44, 0.0 }
 0x167   : > { %v1206_v55 = vadd.f32 %v2862_v40, %v751_v53  ;;  %v1238_v56 = vadd.f32 %v2862_v40, %v879_v54  ;;  %v1269_v61 = vmax.f32 %v1205_v47, 0.0  ;;  %v1301_v62 = vmax.f32 %v1237_v48, 0.0 }
 0x168   : > { %v1272_v59 = vmax.f32 %v1208_v51, 0.0  ;;  %v1304_v60 = vmax.f32 %v1240_v52, 0.0 }
 0x169   : > { %v1270_v63 = vmax.f32 %v1206_v55, 0.0  ;;  %v1302_v0 = vmax.f32 %v1238_v56, 0.0 }
 0x16a   : > { %v1979_v1 = vpack.c.bf16 %v1272_v59, %v1271_v57  ;;  %v2059_v2 = vpack.c.bf16 %v1304_v60, %v1303_v58 }
 0x16b   : > { %v1974_v3 = vpack.c.bf16 %v1270_v63, %v1269_v61  ;;  %v2054_v4 = vpack.c.bf16 %v1302_v0, %v1301_v62  ;;  %v2224_v5 = vpop.f32.mrb[4].mxu0  ;;  %v2256_v6 = vpop.f32.mrb[4].mxu1 }
 0x16c   : > { %2131 = vst [vmem:[%s2874_s20 + $0x8] sm:$0xff] %v1979_v1   ;;  %2147 = vst [vmem:[%s2874_s20 + $0x88] sm:$0xff] %v2059_v2   ;;  %v1211_v7 = vadd.f32 %v2224_v5, %v2862_v40  ;;  %v1243_v8 = vadd.f32 %v2256_v6, %v2862_v40  ;;  %v764_v9 = vpop.f32.mrb[5].mxu0  ;;  %v892_v10 = vpop.f32.mrb[5].mxu1 }
 0x16d   : > { %1975 = vst [vmem:[%s2874_s20] sm:$0xff] %v1974_v3   ;;  %2146 = vst [vmem:[%s2874_s20 + $0x80] sm:$0xff] %v2054_v4   ;;  %v1209_v11 = vadd.f32 %v2862_v40, %v764_v9  ;;  %v1241_v12 = vadd.f32 %v2862_v40, %v892_v10  ;;  %v2225_v13 = vpop.f32.mrb[6].mxu0  ;;  %v2257_v14 = vpop.f32.mrb[6].mxu1 }
 0x16e   : > { %v1212_v15 = vadd.f32 %v2225_v13, %v2862_v40  ;;  %v1244_v16 = vadd.f32 %v2257_v14, %v2862_v40  ;;  %v767_v17 = vpop.f32.mrb[7].mxu0  ;;  %v895_v18 = vpop.f32.mrb[7].mxu1  ;;  %v1275_v21 = vmax.f32 %v1211_v7, 0.0  ;;  %v1307_v22 = vmax.f32 %v1243_v8, 0.0 }
 0x16f   : > { %v1210_v19 = vadd.f32 %v2862_v40, %v767_v17  ;;  %v1242_v20 = vadd.f32 %v2862_v40, %v895_v18  ;;  %v1273_v25 = vmax.f32 %v1209_v11, 0.0  ;;  %v1305_v26 = vmax.f32 %v1241_v12, 0.0 }
 0x170   : > { %v1276_v23 = vmax.f32 %v1212_v15, 0.0  ;;  %v1308_v24 = vmax.f32 %v1244_v16, 0.0 }
 0x171   : > { %v1274_v27 = vmax.f32 %v1210_v19, 0.0  ;;  %v1306_v28 = vmax.f32 %v1242_v20, 0.0 }
 0x172   : > { %v1989_v29 = vpack.c.bf16 %v1276_v23, %v1275_v21  ;;  %v2069_v30 = vpack.c.bf16 %v1308_v24, %v1307_v22 }
 0x173   : > { %v1984_v31 = vpack.c.bf16 %v1274_v27, %v1273_v25  ;;  %v2064_v32 = vpack.c.bf16 %v1306_v28, %v1305_v26  ;;  %v2228_v33 = vpop.f32.mrb[8].mxu0  ;;  %v2260_v34 = vpop.f32.mrb[8].mxu1 }
 0x174   : > { %2133 = vst [vmem:[%s2874_s20 + $0x18] sm:$0xff] %v1989_v29   ;;  %2149 = vst [vmem:[%s2874_s20 + $0x98] sm:$0xff] %v2069_v30   ;;  %v1215_v35 = vadd.f32 %v2228_v33, %v2862_v40  ;;  %v1247_v36 = vadd.f32 %v2260_v34, %v2862_v40  ;;  %v780_v37 = vpop.f32.mrb[9].mxu0  ;;  %v908_v38 = vpop.f32.mrb[9].mxu1 }
 0x175   : > { %2132 = vst [vmem:[%s2874_s20 + $0x10] sm:$0xff] %v1984_v31   ;;  %2148 = vst [vmem:[%s2874_s20 + $0x90] sm:$0xff] %v2064_v32   ;;  %v1213_v39 = vadd.f32 %v2862_v40, %v780_v37  ;;  %v1245_v41 = vadd.f32 %v2862_v40, %v908_v38  ;;  %v2229_v42 = vpop.f32.mrb[10].mxu0  ;;  %v2261_v43 = vpop.f32.mrb[10].mxu1 }
 0x176   : > { %v1216_v44 = vadd.f32 %v2229_v42, %v2862_v40  ;;  %v1248_v45 = vadd.f32 %v2261_v43, %v2862_v40  ;;  %v783_v46 = vpop.f32.mrb[11].mxu0  ;;  %v911_v47 = vpop.f32.mrb[11].mxu1  ;;  %v1279_v50 = vmax.f32 %v1215_v35, 0.0  ;;  %v1311_v51 = vmax.f32 %v1247_v36, 0.0 }
 0x177   : > { %v1214_v48 = vadd.f32 %v2862_v40, %v783_v46  ;;  %v1246_v49 = vadd.f32 %v2862_v40, %v911_v47  ;;  %v1277_v54 = vmax.f32 %v1213_v39, 0.0  ;;  %v1309_v55 = vmax.f32 %v1245_v41, 0.0 }
 0x178   : > { %v1280_v52 = vmax.f32 %v1216_v44, 0.0  ;;  %v1312_v53 = vmax.f32 %v1248_v45, 0.0 }
 0x179   : > { %v1278_v56 = vmax.f32 %v1214_v48, 0.0  ;;  %v1310_v57 = vmax.f32 %v1246_v49, 0.0 }
 0x17a   : > { %v1999_v58 = vpack.c.bf16 %v1280_v52, %v1279_v50  ;;  %v2079_v59 = vpack.c.bf16 %v1312_v53, %v1311_v51 }
 0x17b   : > { %v1994_v60 = vpack.c.bf16 %v1278_v56, %v1277_v54  ;;  %v2074_v61 = vpack.c.bf16 %v1310_v57, %v1309_v55  ;;  %v2232_v62 = vpop.f32.mrb[12].mxu0  ;;  %v2264_v63 = vpop.f32.mrb[12].mxu1 }
 0x17c   : > { %2135 = vst [vmem:[%s2874_s20 + $0x28] sm:$0xff] %v1999_v58   ;;  %2151 = vst [vmem:[%s2874_s20 + $0xa8] sm:$0xff] %v2079_v59   ;;  %v1219_v0 = vadd.f32 %v2232_v62, %v2862_v40  ;;  %v1251_v1 = vadd.f32 %v2264_v63, %v2862_v40  ;;  %v796_v2 = vpop.f32.mrb[13].mxu0  ;;  %v924_v3 = vpop.f32.mrb[13].mxu1 }
 0x17d   : > { %2134 = vst [vmem:[%s2874_s20 + $0x20] sm:$0xff] %v1994_v60   ;;  %2150 = vst [vmem:[%s2874_s20 + $0xa0] sm:$0xff] %v2074_v61   ;;  %v1217_v4 = vadd.f32 %v2862_v40, %v796_v2  ;;  %v1249_v5 = vadd.f32 %v2862_v40, %v924_v3  ;;  %v2233_v6 = vpop.f32.mrb[14].mxu0  ;;  %v2265_v7 = vpop.f32.mrb[14].mxu1 }
 0x17e   : > { %v1220_v8 = vadd.f32 %v2233_v6, %v2862_v40  ;;  %v1252_v9 = vadd.f32 %v2265_v7, %v2862_v40  ;;  %v799_v10 = vpop.f32.mrb[15].mxu0  ;;  %v927_v11 = vpop.f32.mrb[15].mxu1  ;;  %v1283_v14 = vmax.f32 %v1219_v0, 0.0  ;;  %v1315_v15 = vmax.f32 %v1251_v1, 0.0 }
 0x17f   : > { %v1218_v12 = vadd.f32 %v2862_v40, %v799_v10  ;;  %v1250_v13 = vadd.f32 %v2862_v40, %v927_v11  ;;  %v1281_v18 = vmax.f32 %v1217_v4, 0.0  ;;  %v1313_v19 = vmax.f32 %v1249_v5, 0.0 }
 0x180   : > { %v1284_v16 = vmax.f32 %v1220_v8, 0.0  ;;  %v1316_v17 = vmax.f32 %v1252_v9, 0.0 }
 0x181   : > { %v1282_v20 = vmax.f32 %v1218_v12, 0.0  ;;  %v1314_v21 = vmax.f32 %v1250_v13, 0.0 }
 0x182   : > { %v2009_v22 = vpack.c.bf16 %v1284_v16, %v1283_v14  ;;  %v2089_v23 = vpack.c.bf16 %v1316_v17, %v1315_v15 }
 0x183   : > { %v2004_v24 = vpack.c.bf16 %v1282_v20, %v1281_v18  ;;  %v2084_v25 = vpack.c.bf16 %v1314_v21, %v1313_v19  ;;  %v2236_v26 = vpop.f32.mrb[16].mxu0  ;;  %v2268_v27 = vpop.f32.mrb[16].mxu1 }
 0x184   : > { %2137 = vst [vmem:[%s2874_s20 + $0x38] sm:$0xff] %v2009_v22   ;;  %2153 = vst [vmem:[%s2874_s20 + $0xb8] sm:$0xff] %v2089_v23   ;;  %v1223_v28 = vadd.f32 %v2236_v26, %v2862_v40  ;;  %v1255_v29 = vadd.f32 %v2268_v27, %v2862_v40  ;;  %v812_v30 = vpop.f32.mrb[17].mxu0  ;;  %v940_v31 = vpop.f32.mrb[17].mxu1 }
 0x185   : > { %2136 = vst [vmem:[%s2874_s20 + $0x30] sm:$0xff] %v2004_v24   ;;  %2152 = vst [vmem:[%s2874_s20 + $0xb0] sm:$0xff] %v2084_v25   ;;  %v1221_v32 = vadd.f32 %v2862_v40, %v812_v30  ;;  %v1253_v33 = vadd.f32 %v2862_v40, %v940_v31  ;;  %v2237_v34 = vpop.f32.mrb[18].mxu0  ;;  %v2269_v35 = vpop.f32.mrb[18].mxu1 }
 0x186   : > { %v1224_v36 = vadd.f32 %v2237_v34, %v2862_v40  ;;  %v1256_v37 = vadd.f32 %v2269_v35, %v2862_v40  ;;  %v815_v38 = vpop.f32.mrb[19].mxu0  ;;  %v943_v39 = vpop.f32.mrb[19].mxu1  ;;  %v1287_v43 = vmax.f32 %v1223_v28, 0.0  ;;  %v1319_v44 = vmax.f32 %v1255_v29, 0.0 }
 0x187   : > { %v1222_v41 = vadd.f32 %v2862_v40, %v815_v38  ;;  %v1254_v42 = vadd.f32 %v2862_v40, %v943_v39  ;;  %v1285_v47 = vmax.f32 %v1221_v32, 0.0  ;;  %v1317_v48 = vmax.f32 %v1253_v33, 0.0 }
 0x188   : > { %v1288_v45 = vmax.f32 %v1224_v36, 0.0  ;;  %v1320_v46 = vmax.f32 %v1256_v37, 0.0 }
 0x189   : > { %v1286_v49 = vmax.f32 %v1222_v41, 0.0  ;;  %v1318_v50 = vmax.f32 %v1254_v42, 0.0 }
 0x18a   : > { %v2019_v51 = vpack.c.bf16 %v1288_v45, %v1287_v43  ;;  %v2099_v52 = vpack.c.bf16 %v1320_v46, %v1319_v44 }
 0x18b   : > { %v2014_v53 = vpack.c.bf16 %v1286_v49, %v1285_v47  ;;  %v2094_v54 = vpack.c.bf16 %v1318_v50, %v1317_v48  ;;  %v2240_v55 = vpop.f32.mrb[20].mxu0  ;;  %v2272_v56 = vpop.f32.mrb[20].mxu1 }
 0x18c   : > { %2139 = vst [vmem:[%s2874_s20 + $0x48] sm:$0xff] %v2019_v51   ;;  %2155 = vst [vmem:[%s2874_s20 + $0xc8] sm:$0xff] %v2099_v52   ;;  %v1227_v57 = vadd.f32 %v2240_v55, %v2862_v40  ;;  %v1259_v58 = vadd.f32 %v2272_v56, %v2862_v40  ;;  %v828_v59 = vpop.f32.mrb[21].mxu0  ;;  %v956_v60 = vpop.f32.mrb[21].mxu1 }
 0x18d   : > { %2138 = vst [vmem:[%s2874_s20 + $0x40] sm:$0xff] %v2014_v53   ;;  %2154 = vst [vmem:[%s2874_s20 + $0xc0] sm:$0xff] %v2094_v54   ;;  %v1225_v61 = vadd.f32 %v2862_v40, %v828_v59  ;;  %v1257_v62 = vadd.f32 %v2862_v40, %v956_v60  ;;  %v2241_v63 = vpop.f32.mrb[22].mxu0  ;;  %v2273_v0 = vpop.f32.mrb[22].mxu1 }
 0x18e   : > { %v1228_v1 = vadd.f32 %v2241_v63, %v2862_v40  ;;  %v1260_v2 = vadd.f32 %v2273_v0, %v2862_v40  ;;  %v831_v3 = vpop.f32.mrb[23].mxu0  ;;  %v959_v4 = vpop.f32.mrb[23].mxu1  ;;  %v1291_v7 = vmax.f32 %v1227_v57, 0.0  ;;  %v1323_v8 = vmax.f32 %v1259_v58, 0.0 }
 0x18f   : > { %v1226_v5 = vadd.f32 %v2862_v40, %v831_v3  ;;  %v1258_v6 = vadd.f32 %v2862_v40, %v959_v4  ;;  %v1289_v11 = vmax.f32 %v1225_v61, 0.0  ;;  %v1321_v12 = vmax.f32 %v1257_v62, 0.0 }
 0x190   : > { %v1292_v9 = vmax.f32 %v1228_v1, 0.0  ;;  %v1324_v10 = vmax.f32 %v1260_v2, 0.0 }
 0x191   : > { %v1290_v13 = vmax.f32 %v1226_v5, 0.0  ;;  %v1322_v14 = vmax.f32 %v1258_v6, 0.0 }
 0x192   : > { %v2029_v15 = vpack.c.bf16 %v1292_v9, %v1291_v7  ;;  %v2109_v16 = vpack.c.bf16 %v1324_v10, %v1323_v8 }
 0x193   : > { %v2024_v17 = vpack.c.bf16 %v1290_v13, %v1289_v11  ;;  %v2104_v18 = vpack.c.bf16 %v1322_v14, %v1321_v12  ;;  %v2244_v19 = vpop.f32.mrb[24].mxu0  ;;  %v2276_v20 = vpop.f32.mrb[24].mxu1 }
 0x194   : > { %2141 = vst [vmem:[%s2874_s20 + $0x58] sm:$0xff] %v2029_v15   ;;  %2157 = vst [vmem:[%s2874_s20 + $0xd8] sm:$0xff] %v2109_v16   ;;  %v1231_v21 = vadd.f32 %v2244_v19, %v2862_v40  ;;  %v1263_v22 = vadd.f32 %v2276_v20, %v2862_v40  ;;  %v844_v23 = vpop.f32.mrb[25].mxu0  ;;  %v972_v24 = vpop.f32.mrb[25].mxu1 }
 0x195   : > { %2140 = vst [vmem:[%s2874_s20 + $0x50] sm:$0xff] %v2024_v17   ;;  %2156 = vst [vmem:[%s2874_s20 + $0xd0] sm:$0xff] %v2104_v18   ;;  %v1229_v25 = vadd.f32 %v2862_v40, %v844_v23  ;;  %v1261_v26 = vadd.f32 %v2862_v40, %v972_v24  ;;  %v2245_v27 = vpop.f32.mrb[26].mxu0  ;;  %v2277_v28 = vpop.f32.mrb[26].mxu1 }
 0x196   : > { %v1232_v29 = vadd.f32 %v2245_v27, %v2862_v40  ;;  %v1264_v30 = vadd.f32 %v2277_v28, %v2862_v40  ;;  %v847_v31 = vpop.f32.mrb[27].mxu0  ;;  %v975_v32 = vpop.f32.mrb[27].mxu1  ;;  %v1295_v35 = vmax.f32 %v1231_v21, 0.0  ;;  %v1327_v36 = vmax.f32 %v1263_v22, 0.0 }
 0x197   : > { %v1230_v33 = vadd.f32 %v2862_v40, %v847_v31  ;;  %v1262_v34 = vadd.f32 %v2862_v40, %v975_v32  ;;  %v1293_v39 = vmax.f32 %v1229_v25, 0.0  ;;  %v1325_v41 = vmax.f32 %v1261_v26, 0.0 }
 0x198   : > { %v1296_v37 = vmax.f32 %v1232_v29, 0.0  ;;  %v1328_v38 = vmax.f32 %v1264_v30, 0.0 }
 0x199   : > { %v1294_v42 = vmax.f32 %v1230_v33, 0.0  ;;  %v1326_v43 = vmax.f32 %v1262_v34, 0.0 }
 0x19a   : > { %v2039_v44 = vpack.c.bf16 %v1296_v37, %v1295_v35  ;;  %v2119_v45 = vpack.c.bf16 %v1328_v38, %v1327_v36 }
 0x19b   : > { %v2034_v46 = vpack.c.bf16 %v1294_v42, %v1293_v39  ;;  %v2114_v47 = vpack.c.bf16 %v1326_v43, %v1325_v41  ;;  %v2248_v48 = vpop.f32.mrb[28].mxu0  ;;  %v2280_v49 = vpop.f32.mrb[28].mxu1 }
 0x19c   : > { %2143 = vst [vmem:[%s2874_s20 + $0x68] sm:$0xff] %v2039_v44   ;;  %2159 = vst [vmem:[%s2874_s20 + $0xe8] sm:$0xff] %v2119_v45   ;;  %v1235_v50 = vadd.f32 %v2248_v48, %v2862_v40  ;;  %v1267_v51 = vadd.f32 %v2280_v49, %v2862_v40  ;;  %v860_v52 = vpop.f32.mrb[29].mxu0  ;;  %v988_v53 = vpop.f32.mrb[29].mxu1 }
 0x19d   : > { %2142 = vst [vmem:[%s2874_s20 + $0x60] sm:$0xff] %v2034_v46   ;;  %2158 = vst [vmem:[%s2874_s20 + $0xe0] sm:$0xff] %v2114_v47   ;;  %v1233_v54 = vadd.f32 %v2862_v40, %v860_v52  ;;  %v1265_v55 = vadd.f32 %v2862_v40, %v988_v53  ;;  %v2249_v56 = vpop.f32.mrb[30].mxu0  ;;  %v2281_v57 = vpop.f32.mrb[30].mxu1 }
 0x19e   : > { %v1236_v58 = vadd.f32 %v2249_v56, %v2862_v40  ;;  %v1268_v59 = vadd.f32 %v2281_v57, %v2862_v40  ;;  %v863_v60 = vpop.f32.mrb[31].mxu0  ;;  %v991_v61 = vpop.f32.mrb[31].mxu1  ;;  %v1299_v0 = vmax.f32 %v1235_v50, 0.0  ;;  %v1331_v1 = vmax.f32 %v1267_v51, 0.0 }
 0x19f   : > { %v1234_v62 = vadd.f32 %v2862_v40, %v863_v60  ;;  %v1266_v63 = vadd.f32 %v2862_v40, %v991_v61  ;;  %v1297_v4 = vmax.f32 %v1233_v54, 0.0  ;;  %v1329_v5 = vmax.f32 %v1265_v55, 0.0 }
 0x1a0   : > { %v1300_v2 = vmax.f32 %v1236_v58, 0.0  ;;  %v1332_v3 = vmax.f32 %v1268_v59, 0.0 }
 0x1a1   : > { %v1298_v6 = vmax.f32 %v1234_v62, 0.0  ;;  %v1330_v7 = vmax.f32 %v1266_v63, 0.0 }
 0x1a2   : > { %v2049_v8 = vpack.c.bf16 %v1300_v2, %v1299_v0  ;;  %v2129_v9 = vpack.c.bf16 %v1332_v3, %v1331_v1 }
 0x1a3   : > { %v2044_v40 = vpack.c.bf16 %v1298_v6, %v1297_v4  ;;  %v2124_v10 = vpack.c.bf16 %v1330_v7, %v1329_v5 }
 0x1a4   : > { %2145 = vst [vmem:[%s2874_s20 + $0x78] sm:$0xff] %v2049_v8   ;;  %2161 = vst [vmem:[%s2874_s20 + $0xf8] sm:$0xff] %v2129_v9  }
 0x1a5   : > { %2144 = vst [vmem:[%s2874_s20 + $0x70] sm:$0xff] %v2044_v40   ;;  %2160 = vst [vmem:[%s2874_s20 + $0xf0] sm:$0xff] %v2124_v10  }
 0x1a6   : > { %2524 = shalt.err (!%p2521_p5)
}
 0x1a7   : > { %s2525_s21 = scalar_lea.hbm %s2965_s15, 4096  ;;  %s2529_s5 = scalar_lea.hbm %s3022_s3, 131072 }
 0x1a8   : > { %p2526_p9 = scmp.ne.s32.totalorder %s2965_s15, %s2525_s21  ;;  %p2530_p3 = scmp.lt.u32.totalorder %s2965_s15, %s3022_s3 }
 0x1a9   : > { %p2531_p7 = scmp.lt.u32.totalorder %s2529_s5, %s2525_s21  ;;  %p2533_p2 = scmp.lt.u32.totalorder %s2525_s21, %s2965_s15 }
 0x1aa   : > { %p2527_p12 = pnand %p2526_p9, %p2756_p11 }
 0x1ab   : > { %p2532_p10 = por %p2531_p7, %p2530_p3 }
 0x1ac   : > { %p2528_p1 = pneg %p2527_p12 }
 0x1ad   : > { %p2534_p4 = por %p2533_p2, %p2532_p10 }
 0x1af   : > { %p2535_p6 = pnand %p2534_p4, %p2528_p1 }
 0x1b1   : > { %2538 = shalt.err (!%p2535_p6)
}
 0x1b2   : > { %s2605_s20 = smov 64   ;;  %s2606_s22 = smov 4  }
 0x1b3   : > { %2308 = dma.vmem_to_hbm [thread:$0]  (%p2756_p11), %s2967_s24, 4096, %s2965_s15, %s1654_s26, %s2605_s20, %s2605_s20, %s2606_s22  }
 0x1b4 PF: > { %p2330_p8 = scmp.ge.s32.totalorder %s2597_s17, 2  ;;  %s1683_s11 = sand.u32 1, %s2577_s12  }
 0x1b5   : > { %p3039_p13 = scmp.ne.s32.totalorder %s3030_s23, 0  ;;  %s1684_s18 = scalar_lea.sflag [#allocation5], %s1683_s11 }
 0x1b7   : > { %p2322_p0 = pnand %p2330_p8, %p3039_p13 }
 0x1b9   : > { %2572 = dma.done.wait (!%p2322_p0), %s1684_s18, 4096  }
 0x1ba   : > { %2574 = vsyncadd (!%p2322_p0), %s1684_s18, 4294963200  ;;  %s20_s17 = sadd.s32 1, %s2597_s17   ;;  %s3040_s12 = smov %s2581_s13 }
 0x1bb   : > { %p17_p5 = scmp.ge.s32.totalorder %s20_s17, 34   ;;  %s3041_s13 = smov %s2585_s14 }
 0x1bc   : > { %s3042_s14 = smov %s2765_s6  ;;  %s3043_s15 = smov %s2593_s16 }
 0x1bd   : > { %s3044_s16 = smov %s3046_s25  ;;  %19 = sbr.rel (!%p17_p5) target bundleno = 7 (0x7), region = 95 }
 0x1c4   :  { %1689 = vsyncpa [#allocation4], 1 }
 0x1c5   :  { %1691 = vsyncpa [#allocation4 + $0x1], 1 }
 0x1c6   :  { %1692 = vsyncpa [#allocation7], 1 }
 0x1c7   :  { %1693 = vsyncpa [#allocation5], 1 }
 0x1c8   :  { %1695 = vsyncpa [#allocation5 + $0x1], 1 }

</bundles_post_ra>
